<compile_context>
chip_gen: v5e
topology: v5e:2x2
jax: 0.10.0
libtpu: 0.0.40
codegen_flags: <defaults>
</compile_context>

<pallas_src>
import functools
import math

import jax
import jax.numpy as jnp
from jax import lax
from jax.experimental import pallas as pl
from jax.experimental.pallas import tpu as pltpu


def _hybrid_margin_loss_kernel(
    # inputs
    emb_f32_ref,     # (B, E)  f32   L2-normalized embeddings (constant block)
    emb_bf16_ref,    # (B, E)  bf16  L2-normalized embeddings, MXU feed (constant)
    labels_col_ref,  # (B, 1)  i32
    labels_row_ref,  # (1, B)  i32
    cbatch_ref,      # (B, E)  f32   centers[labels], gathered in the wrapper
    w_ref,           # (1, K, E, tC) bf16  column-normalized sub-center weight chunk
    # outputs
    out_ref,         # (1, 1)  f32   total loss
    # scratch (persist across class chunks)
    l_sc,            # (B, 1)  f32   sum exp(logit - arc_scale)
    tgt_sc,          # (B, 1)  f32   margin-adjusted target logit
    *,
    num_classes: int,
    mask_classes: bool,
    cos_m: float,
    sin_m: float,
    arc_scale: float,
    triplet_margin: float,
    center_weight: float,
    row_tile: int,
):
    f32 = jnp.float32
    j = pl.program_id(0)
    nj = pl.num_programs(0)
    B = l_sc.shape[0]
    K = w_ref.shape[1]
    tC = w_ref.shape[3]

    # ---- init (first class chunk): zero the LSE / target accumulators ----
    @pl.when(j == 0)
    def _init():
        l_sc[...] = jnp.zeros((B, 1), f32)
        tgt_sc[...] = jnp.zeros((B, 1), f32)

    labels_col = labels_col_ref[...]                                # (B, 1) i32

    # ---- SubCenter ArcFace: cosines for this class chunk, max over K sub-centers ----
    eb = emb_bf16_ref[...]                                          # (B, E) bf16
    cos = jnp.dot(eb, w_ref[0, 0], preferred_element_type=f32)      # (B, tC) f32
    for k in range(1, K):
        cos = jnp.maximum(cos, jnp.dot(eb, w_ref[0, k], preferred_element_type=f32))

    base = j * tC
    class_ids = base + lax.broadcasted_iota(jnp.int32, (B, tC), 1)
    onehot = (labels_col == class_ids).astype(f32)                  # (B, tC)
    # Range test instead of a second cross-lane reduction.
    in_chunk = jnp.logical_and(labels_col >= base, labels_col < base + tC)

    # Margin only on the (B,1) target cosine.
    cos_tgt = jnp.sum(onehot * cos, axis=1, keepdims=True)          # (B, 1)
    eps = 1e-7
    cos_c = jnp.clip(cos_tgt, -1.0 + eps, 1.0 - eps)
    sin_c = jnp.sqrt(jnp.maximum(1.0 - cos_c * cos_c, 0.0))
    phi = cos_c * cos_m - sin_c * sin_m                             # cos(theta + m)
    delta = jnp.where(in_chunk, phi - cos_tgt, 0.0)                 # (B, 1)
    logits = arc_scale * (cos + onehot * delta)                     # (B, tC)
    if mask_classes:
        # Padded classes (class_id >= num_classes) contribute nothing to the LSE.
        logits = jnp.where(class_ids < num_classes, logits, f32(-1e30))

    # Fixed-max log-sum-exp across class chunks: |logit| <= arc_scale, so
    # exp(logit - arc_scale) in [e^{-2*scale}, 1] is safely representable in f32.
    l_sc[...] = l_sc[...] + jnp.sum(jnp.exp(logits - arc_scale), axis=1, keepdims=True)
    tgt_sc[...] = tgt_sc[...] + jnp.where(in_chunk, arc_scale * phi, 0.0)

    # ---- finalize (last class chunk): arc CE, batch-hard triplet, center loss ----
    @pl.when(j == nj - 1)
    def _finalize():
        # ArcFace cross-entropy, mean over batch.
        ce = (arc_scale + jnp.log(l_sc[...])) - tgt_sc[...]         # (B, 1)
        loss_arc = jnp.sum(ce, axis=0, keepdims=True) * (1.0 / B)   # (1, 1)

        # BatchHard + TripletMargin.  Unit-norm rows => d2 = 2 - 2*gram.
        # f32 gram (accuracy) computed per anchor-row block to bound live temps.
        en = emb_f32_ref[...]                                       # (B, E) f32
        labels_row = labels_row_ref[...]                            # (1, B)
        big = f32(1e9)
        tR = row_tile
        nblk = B // tR

        def row_block(rb, carry):
            ts, nn = carry
            r0 = pl.multiple_of(rb * tR, tR)
            en_blk = emb_f32_ref[pl.ds(r0, tR), :]                  # (tR, E)
            lab_blk = labels_col_ref[pl.ds(r0, tR), :]              # (tR, 1)
            gram = lax.dot_general(en_blk, en, (((1,), (1,)), ((), ())),
                                   preferred_element_type=f32)      # (tR, B)
            d2 = jnp.maximum(2.0 - 2.0 * gram, 0.0)
            same = lab_blk == labels_row                            # (tR, B)
            row_ids = r0 + lax.broadcasted_iota(jnp.int32, (tR, B), 0)
            col_ids = lax.broadcasted_iota(jnp.int32, (tR, B), 1)
            pos_mask = jnp.logical_and(same, row_ids != col_ids)
            neg_mask = jnp.logical_not(same)
            # Arg-reduce on squared distance (monotone); sqrt only on (tR,1) results.
            d_ap2 = jnp.max(jnp.where(pos_mask, d2, -big), axis=1, keepdims=True)
            d_an2 = jnp.min(jnp.where(neg_mask, d2, big), axis=1, keepdims=True)
            valid = jnp.logical_and(d_ap2 > -0.5 * big, d_an2 < 0.5 * big)
            d_ap = jnp.sqrt(jnp.maximum(d_ap2, 0.0))
            d_an = jnp.sqrt(jnp.maximum(d_an2, 0.0))
            trip = jnp.maximum(d_ap - d_an + triplet_margin, 0.0)
            trip = jnp.where(valid, trip, 0.0)                      # (tR, 1)
            ts = ts + jnp.sum(trip, axis=0, keepdims=True)
            nn = nn + jnp.sum((trip > 0.0).astype(f32), axis=0, keepdims=True)
            return ts, nn

        zero11 = jnp.zeros((1, 1), f32)
        trip_sum, nnz = lax.fori_loop(0, nblk, row_block, (zero11, zero11))
        loss_trip = jnp.where(nnz > 0.0, trip_sum / jnp.maximum(nnz, 1.0),
                              zero11)                               # AvgNonZero

        # Center loss on the normalized embeddings (centers gathered in the wrapper).
        diff = en - cbatch_ref[...]
        loss_center = jnp.sum(jnp.sum(diff * diff, axis=1, keepdims=True),
                              axis=0, keepdims=True) * (1.0 / B)    # (1, 1)

        out_ref[...] = loss_arc + 0.5 * loss_trip + center_weight * loss_center


# ----------------------------- wrapper-side helpers -----------------------------
def _round_up(x: int, m: int) -> int:
    return -(-x // m) * m


def _vmem_limit_bytes() -> int:
    """Per-generation VMEM request with headroom for compiler-internal scratch."""
    cap = 64 * 1024 * 1024
    try:
        info = pltpu.get_tpu_info()
        cap = int(getattr(info, "vmem_capacity_bytes", cap) or cap)
    except Exception:
        pass
    return max(min(cap - 16 * 1024 * 1024, 100 * 1024 * 1024), 32 * 1024 * 1024)


def _pick_class_tile(C: int, K: int, E: int, B: int, vmem_limit: int) -> int:
    """Largest lane-dense class chunk whose double-buffered weight block fits VMEM."""
    c128 = _round_up(C, 128)
    # Constant-resident blocks + (B,1) scratches, rough bytes, plus slack.
    fixed = 2 * B * E * 4 + B * E * 2 + 4 * B * 128 * 4 + (2 << 20)
    for cand in (2048, 1024, 512, 256, 128):
        if cand <= c128 and c128 % cand == 0:
            if fixed + 2 * (K * E * cand * 2) <= vmem_limit:
                return cand
    return 128


def _pick_row_tile(B: int) -> int:
    if B <= 128:
        return B
    for cand in (128, 64, 32, 16, 8):
        if B % cand == 0:
            return cand
    return B


def _const_spec(shape):
    """Constant-index BlockSpec; single-buffered when pipeline_mode is supported."""
    idx = lambda j: tuple(0 for _ in shape)
    try:
        return pl.BlockSpec(shape, idx, pipeline_mode=pl.Buffered(1))
    except Exception:
        return pl.BlockSpec(shape, idx)


def hybrid_margin_loss(embeddings, labels, w_subcenters, centers, *,
                       num_classes, k_subcenters=3,
                       arc_margin=0.4, arc_scale=30.0,
                       triplet_margin=0.3, center_loss_weight=0.01,
                       class_tile=None):
    B, E = embeddings.shape
    C, K = int(num_classes), int(k_subcenters)
    assert w_subcenters.shape == (E, C * K)
    assert centers.shape == (C, E)
    f32 = jnp.float32

    # ---- wrapper-side prep (hoisted out of the kernel) ----
    # F.normalize(embeddings, p=2, dim=1) once in f32; bf16 copy feeds the MXU.
    e = embeddings.astype(f32)
    en = e * lax.rsqrt(jnp.maximum(jnp.sum(e * e, axis=1, keepdims=True), 1e-24))
    en_bf16 = en.astype(jnp.bfloat16)

    labels_i32 = labels.astype(jnp.int32)
    labels_col = labels_i32.reshape(B, 1)
    labels_row = labels_i32.reshape(1, B)

    # centers[labels] gathered here (B*E values) — removes the (C,E) centers DMA
    # stream and the per-chunk one-hot matmul from the kernel.
    centers_batch = jnp.take(centers.astype(f32), labels_i32, axis=0)   # (B, E)

    # Class tile / padding (lane-dense, VMEM-aware; no tC=C fallback).
    vmem_limit = _vmem_limit_bytes()
    tC = int(class_tile) if class_tile is not None else _pick_class_tile(
        C, K, E, B, vmem_limit)
    C_pad = _round_up(C, tC)
    num_chunks = C_pad // tC

    # ArcFace sub-center weights: column-L2-normalize once in f32 (column index of the
    # (E, C*K) parameter is c*K + k), pad the class axis, then pre-tile to
    # (num_chunks, K, E, tC) so every grid step DMAs one contiguous HBM slab.
    w = w_subcenters.astype(f32).reshape(E, C, K)
    wn = w * lax.rsqrt(jnp.maximum(jnp.sum(w * w, axis=0, keepdims=True), 1e-24))
    wn = jnp.pad(wn, ((0, 0), (0, C_pad - C), (0, 0)))
    w_tiled = jnp.transpose(wn, (2, 0, 1))                      # (K, E, C_pad)
    w_tiled = w_tiled.reshape(K, E, num_chunks, tC)
    w_tiled = jnp.transpose(w_tiled, (2, 0, 1, 3)).astype(jnp.bfloat16)  # (nc,K,E,tC)

    kernel = functools.partial(
        _hybrid_margin_loss_kernel,
        num_classes=C,
        mask_classes=(C_pad != C),
        cos_m=float(math.cos(arc_margin)), sin_m=float(math.sin(arc_margin)),
        arc_scale=float(arc_scale), triplet_margin=float(triplet_margin),
        center_weight=float(center_loss_weight),
        row_tile=_pick_row_tile(B))

    out = pl.pallas_call(
        kernel,
        out_shape=jax.ShapeDtypeStruct((1, 1), jnp.float32),
        grid_spec=pltpu.PrefetchScalarGridSpec(
            num_scalar_prefetch=0,
            grid=(num_chunks,),
            in_specs=[
                _const_spec((B, E)),                                 # normalized emb f32
                _const_spec((B, E)),                                 # normalized emb bf16
                pl.BlockSpec((B, 1), lambda j: (0, 0)),              # labels column
                pl.BlockSpec((1, B), lambda j: (0, 0)),              # labels row
                _const_spec((B, E)),                                 # centers[labels]
                pl.BlockSpec((1, K, E, tC), lambda j: (j, 0, 0, 0)),  # weight chunk
            ],
            out_specs=pl.BlockSpec((1, 1), lambda j: (0, 0)),
            scratch_shapes=[
                pltpu.VMEM((B, 1), jnp.float32),   # sum exp(logit - arc_scale)
                pltpu.VMEM((B, 1), jnp.float32),   # margin-adjusted target logit
            ],
        ),
        compiler_params=pltpu.CompilerParams(
            dimension_semantics=("arbitrary",),
            vmem_limit_bytes=vmem_limit,
        ),
    )(en, en_bf16, labels_col, labels_row, centers_batch, w_tiled)
    return out[0, 0]


# ---------------- pure-JAX reference (f32) for a sanity check ----------------
def _reference(embeddings, labels, w_subcenters, centers, *, num_classes,
               k_subcenters=3, arc_margin=0.4, arc_scale=30.0,
               triplet_margin=0.3, center_loss_weight=0.01):
    B, E = embeddings.shape
    C, K = num_classes, k_subcenters
    e = embeddings.astype(jnp.float32)
    en = e / jnp.maximum(jnp.linalg.norm(e, axis=1, keepdims=True), 1e-12)
    w = w_subcenters.astype(jnp.float32).reshape(E, C, K)
    wn = w / jnp.maximum(jnp.linalg.norm(w, axis=0, keepdims=True), 1e-12)
    cos = jnp.max(jnp.einsum('be,eck->bck', en, wn), axis=-1)          # (B, C)
    onehot = jax.nn.one_hot(labels, C, dtype=jnp.float32)
    cos_tgt = jnp.sum(onehot * cos, axis=1, keepdims=True)
    eps = 1e-7
    cos_c = jnp.clip(cos_tgt, -1.0 + eps, 1.0 - eps)
    phi = cos_c * math.cos(arc_margin) - jnp.sqrt(1.0 - cos_c * cos_c) * math.sin(arc_margin)
    logits = arc_scale * (cos + onehot * (phi - cos_tgt))
    lse = jax.scipy.special.logsumexp(logits, axis=1)
    tgt = jnp.sum(onehot * logits, axis=1)
    loss_arc = jnp.mean(lse - tgt)
    dist = jnp.sqrt(jnp.maximum(
        jnp.sum((en[:, None, :] - en[None, :, :]) ** 2, axis=-1), 0.0))
    same = labels[:, None] == labels[None, :]
    eye = jnp.eye(B, dtype=bool)
    pos_mask = same & ~eye
    neg_mask = ~same
    d_ap = jnp.max(jnp.where(pos_mask, dist, -jnp.inf), axis=1)
    d_an = jnp.min(jnp.where(neg_mask, dist, jnp.inf), axis=1)
    valid = jnp.any(pos_mask, axis=1) & jnp.any(neg_mask, axis=1)
    trip = jnp.where(valid, jnp.maximum(d_ap - d_an + triplet_margin, 0.0), 0.0)
    nnz = jnp.sum((trip > 0.0).astype(jnp.float32))
    loss_trip = jnp.where(nnz > 0, jnp.sum(trip) / jnp.maximum(nnz, 1.0), 0.0)
    cb = centers.astype(jnp.float32)[labels]
    loss_center = jnp.mean(jnp.sum((en - cb) ** 2, axis=1))
    return loss_arc + 0.5 * loss_trip + center_loss_weight * loss_center


if __name__ == "__main__":
    def run_case(key, B, E, C, K, labels, class_tile=None):
        k_emb, k_w, k_c = jax.random.split(key, 3)
        embeddings = jax.random.normal(k_emb, (B, E), jnp.float32)
        w_subcenters = 0.01 * jax.random.normal(k_w, (E, C * K), jnp.float32)
        centers = jax.random.normal(k_c, (C, E), jnp.float32)
        loss = hybrid_margin_loss(embeddings, labels, w_subcenters, centers,
                                  num_classes=C, k_subcenters=K,
                                  class_tile=class_tile)
        loss = jax.block_until_ready(loss)
        assert loss.shape == () and bool(jnp.isfinite(loss)), loss
        ref = jax.block_until_ready(
            _reference(embeddings, labels, w_subcenters, centers, num_classes=C,
                       k_subcenters=K))
        rel = abs(float(loss) - float(ref)) / max(abs(float(ref)), 1.0)
        # Only the ArcFace matmuls are bf16; everything else is f32 -> tight-ish check.
        assert rel < 0.05, (float(loss), float(ref), rel)

    key = jax.random.PRNGKey(0)
    k1, k2 = jax.random.split(key)
    # Small config: C=4 padded to 128 classes (exercises class masking); labels 2 and 3
    # are singletons, i.e. anchors with no positive get masked out of the triplet term.
    run_case(k1, B=8, E=32, C=4, K=3,
             labels=jnp.array([0, 0, 0, 1, 1, 1, 2, 3], jnp.int32))
    # Larger config with a forced small class tile to exercise the multi-chunk
    # fixed-max online-softmax accumulation path (1024 classes -> 4 chunks of 256).
    run_case(k2, B=16, E=128, C=1024, K=3,
             labels=(jnp.arange(16, dtype=jnp.int32) % 8),
             class_tile=256)
    print("KERNEL_OK")
</pallas_src>

<mosaic_0001>
module attributes {stable_mosaic.version = 11 : i64} {
  func.func @_hybrid_margin_loss_kernel(%arg0: i32, %arg1: memref<8x32xf32, #tpu.memory_space<vmem>>, %arg2: memref<8x32xbf16, #tpu.memory_space<vmem>>, %arg3: memref<8x1xi32, #tpu.memory_space<vmem>>, %arg4: memref<1x8xi32, #tpu.memory_space<vmem>>, %arg5: memref<8x32xf32, #tpu.memory_space<vmem>>, %arg6: memref<1x3x32x128xbf16, #tpu.memory_space<vmem>>, %arg7: memref<1x1xf32, #tpu.memory_space<vmem>>, %arg8: memref<8x1xf32, #tpu.memory_space<vmem>>, %arg9: memref<8x1xf32, #tpu.memory_space<vmem>>) attributes {dimension_semantics = [#tpu.dimension_semantics<arbitrary>], iteration_bounds = array<i64: 1>, scalar_prefetch = 0 : i64, scratch_operands = 2 : i64, tpu.core_type = #tpu.core_type<tc>, window_params = [{pipeline_mode = #tpu.pipeline_mode<synchronous>, transform_indices = @transform_0, window_bounds = array<i64: 8, 32>}, {pipeline_mode = #tpu.pipeline_mode<synchronous>, transform_indices = @transform_1, window_bounds = array<i64: 8, 32>}, {pipeline_mode = #tpu.pipeline_mode<synchronous>, transform_indices = @transform_2, window_bounds = array<i64: 8, 1>}, {pipeline_mode = #tpu.pipeline_mode<synchronous>, transform_indices = @transform_3, window_bounds = array<i64: 1, 8>}, {pipeline_mode = #tpu.pipeline_mode<synchronous>, transform_indices = @transform_4, window_bounds = array<i64: 8, 32>}, {transform_indices = @transform_5, window_bounds = array<i64: 1, 3, 32, 128>}, {pipeline_mode = #tpu.pipeline_mode<synchronous>, transform_indices = @transform_6, window_bounds = array<i64: 1, 1>}]} {
    %c0_i32 = arith.constant 0 : i32
    %0 = arith.cmpi eq, %arg0, %c0_i32 : i32
    %1 = arith.extui %0 : i1 to i32
    %c0_i32_0 = arith.constant 0 : i32
    %2 = arith.cmpi ne, %1, %c0_i32_0 : i32
    scf.if %2 {
      %cst_41 = arith.constant 0.000000e+00 : f32
      %78 = vector.broadcast %cst_41 : f32 to vector<8x1xf32>
      %c0_42 = arith.constant 0 : index
      %c0_43 = arith.constant 0 : index
      %79 = vector.load %arg8[%c0_42, %c0_43] : memref<8x1xf32, #tpu.memory_space<vmem>>, vector<8x1xf32>
      tpu.vector_store %arg8[%c0_42, %c0_43], %78 {strides = array<i32>} : memref<8x1xf32, #tpu.memory_space<vmem>>, vector<8x1xf32>,
      %cst_44 = arith.constant 0.000000e+00 : f32
      %80 = vector.broadcast %cst_44 : f32 to vector<8x1xf32>
      %c0_45 = arith.constant 0 : index
      %c0_46 = arith.constant 0 : index
      %81 = vector.load %arg9[%c0_45, %c0_46] : memref<8x1xf32, #tpu.memory_space<vmem>>, vector<8x1xf32>
      tpu.vector_store %arg9[%c0_45, %c0_46], %80 {strides = array<i32>} : memref<8x1xf32, #tpu.memory_space<vmem>>, vector<8x1xf32>,
    } else {
    }
    %c0 = arith.constant 0 : index
    %c0_1 = arith.constant 0 : index
    %3 = vector.load %arg3[%c0, %c0_1] : memref<8x1xi32, #tpu.memory_space<vmem>>, vector<8x1xi32>
    %c0_2 = arith.constant 0 : index
    %c0_3 = arith.constant 0 : index
    %4 = vector.load %arg2[%c0_2, %c0_3] : memref<8x32xbf16, #tpu.memory_space<vmem>>, vector<8x32xbf16>
    %c0_4 = arith.constant 0 : index
    %c0_5 = arith.constant 0 : index
    %c0_6 = arith.constant 0 : index
    %c0_7 = arith.constant 0 : index
    %5 = vector.load %arg6[%c0_4, %c0_5, %c0_6, %c0_7] : memref<1x3x32x128xbf16, #tpu.memory_space<vmem>>, vector<1x1x32x128xbf16>
    %6 = vector.shape_cast %5 : vector<1x1x32x128xbf16> to vector<32x128xbf16>
    %cst = arith.constant dense<0.000000e+00> : vector<8x128xf32>
    %7 = tpu.matmul %4, %6, %cst {dimension_numbers = #tpu.dot_dimension_numbers<[1], [0], [0], [1], [0, 0, 1, 1], [], []>} : vector<8x32xbf16>, vector<32x128xbf16>, vector<8x128xf32> -> vector<8x128xf32>
    %c0_8 = arith.constant 0 : index
    %c1 = arith.constant 1 : index
    %c0_9 = arith.constant 0 : index
    %c0_10 = arith.constant 0 : index
    %8 = vector.load %arg6[%c0_8, %c1, %c0_9, %c0_10] : memref<1x3x32x128xbf16, #tpu.memory_space<vmem>>, vector<1x1x32x128xbf16>
    %9 = vector.shape_cast %8 : vector<1x1x32x128xbf16> to vector<32x128xbf16>
    %cst_11 = arith.constant dense<0.000000e+00> : vector<8x128xf32>
    %10 = tpu.matmul %4, %9, %cst_11 {dimension_numbers = #tpu.dot_dimension_numbers<[1], [0], [0], [1], [0, 0, 1, 1], [], []>} : vector<8x32xbf16>, vector<32x128xbf16>, vector<8x128xf32> -> vector<8x128xf32>
    %11 = arith.maximumf %7, %10 : vector<8x128xf32>
    %c0_12 = arith.constant 0 : index
    %c2 = arith.constant 2 : index
    %c0_13 = arith.constant 0 : index
    %c0_14 = arith.constant 0 : index
    %12 = vector.load %arg6[%c0_12, %c2, %c0_13, %c0_14] : memref<1x3x32x128xbf16, #tpu.memory_space<vmem>>, vector<1x1x32x128xbf16>
    %13 = vector.shape_cast %12 : vector<1x1x32x128xbf16> to vector<32x128xbf16>
    %cst_15 = arith.constant dense<0.000000e+00> : vector<8x128xf32>
    %14 = tpu.matmul %4, %13, %cst_15 {dimension_numbers = #tpu.dot_dimension_numbers<[1], [0], [0], [1], [0, 0, 1, 1], [], []>} : vector<8x32xbf16>, vector<32x128xbf16>, vector<8x128xf32> -> vector<8x128xf32>
    %15 = arith.maximumf %11, %14 : vector<8x128xf32>
    %c128_i32 = arith.constant 128 : i32
    %16 = arith.muli %arg0, %c128_i32 : i32
    %17 = tpu.iota {dimensions = array<i32: 1>} : vector<8x128xi32>
    %18 = vector.broadcast %16 : i32 to vector<8x128xi32>
    %19 = arith.addi %18, %17 : vector<8x128xi32>
    %20 = vector.broadcast %3 : vector<8x1xi32> to vector<8x128xi32>
    %21 = arith.cmpi eq, %20, %19 : vector<8x128xi32>
    %22 = arith.extui %21 : vector<8x128xi1> to vector<8x128xi32>
    %23 = arith.sitofp %22 : vector<8x128xi32> to vector<8x128xf32>
    %24 = vector.broadcast %16 : i32 to vector<8x1xi32>
    %25 = arith.cmpi sge, %3, %24 : vector<8x1xi32>
    %c128_i32_16 = arith.constant 128 : i32
    %26 = arith.addi %16, %c128_i32_16 : i32
    %27 = vector.broadcast %26 : i32 to vector<8x1xi32>
    %28 = arith.cmpi slt, %3, %27 : vector<8x1xi32>
    %29 = arith.andi %25, %28 : vector<8x1xi1>
    %30 = arith.mulf %23, %15 : vector<8x128xf32>
    %cst_17 = arith.constant dense<0.000000e+00> : vector<8xf32>
    %31 = vector.multi_reduction <add>, %30, %cst_17 [1] : vector<8x128xf32> to vector<8xf32>
    %32 = vector.shape_cast %31 : vector<8xf32> to vector<8x1xf32>
    %cst_18 = arith.constant -0.99999988 : f32
    %cst_19 = arith.constant 0.99999988 : f32
    %33 = vector.broadcast %cst_18 : f32 to vector<8x1xf32>
    %34 = arith.maximumf %33, %32 : vector<8x1xf32>
    %35 = vector.broadcast %cst_19 : f32 to vector<8x1xf32>
    %36 = arith.minimumf %35, %34 : vector<8x1xf32>
    %37 = arith.mulf %36, %36 : vector<8x1xf32>
    %cst_20 = arith.constant 1.000000e+00 : f32
    %38 = vector.broadcast %cst_20 : f32 to vector<8x1xf32>
    %39 = arith.subf %38, %37 : vector<8x1xf32>
    %cst_21 = arith.constant 0.000000e+00 : f32
    %40 = vector.broadcast %cst_21 : f32 to vector<8x1xf32>
    %41 = arith.maximumf %39, %40 : vector<8x1xf32>
    %42 = math.sqrt %41 : vector<8x1xf32>
    %cst_22 = arith.constant 0.921060979 : f32
    %43 = vector.broadcast %cst_22 : f32 to vector<8x1xf32>
    %44 = arith.mulf %36, %43 : vector<8x1xf32>
    %cst_23 = arith.constant 0.389418334 : f32
    %45 = vector.broadcast %cst_23 : f32 to vector<8x1xf32>
    %46 = arith.mulf %42, %45 : vector<8x1xf32>
    %47 = arith.subf %44, %46 : vector<8x1xf32>
    %48 = arith.subf %47, %32 : vector<8x1xf32>
    %cst_24 = arith.constant 0.000000e+00 : f32
    %49 = vector.broadcast %cst_24 : f32 to vector<8x1xf32>
    %50 = arith.select %29, %48, %49 : vector<8x1xi1>, vector<8x1xf32>
    %51 = vector.broadcast %50 : vector<8x1xf32> to vector<8x128xf32>
    %52 = arith.mulf %23, %51 : vector<8x128xf32>
    %53 = arith.addf %15, %52 : vector<8x128xf32>
    %cst_25 = arith.constant 3.000000e+01 : f32
    %54 = vector.broadcast %cst_25 : f32 to vector<8x128xf32>
    %55 = arith.mulf %54, %53 : vector<8x128xf32>
    %c4_i32 = arith.constant 4 : i32
    %56 = vector.broadcast %c4_i32 : i32 to vector<8x128xi32>
    %57 = arith.cmpi slt, %19, %56 : vector<8x128xi32>
    %cst_26 = arith.constant -1.000000e+30 : f32
    %58 = vector.broadcast %cst_26 : f32 to vector<8x128xf32>
    %59 = arith.select %57, %55, %58 : vector<8x128xi1>, vector<8x128xf32>
    %c0_27 = arith.constant 0 : index
    %c0_28 = arith.constant 0 : index
    %60 = vector.load %arg8[%c0_27, %c0_28] : memref<8x1xf32, #tpu.memory_space<vmem>>, vector<8x1xf32>
    %cst_29 = arith.constant 3.000000e+01 : f32
    %61 = vector.broadcast %cst_29 : f32 to vector<8x128xf32>
    %62 = arith.subf %59, %61 : vector<8x128xf32>
    %63 = math.exp %62 : vector<8x128xf32>
    %cst_30 = arith.constant dense<0.000000e+00> : vector<8xf32>
    %64 = vector.multi_reduction <add>, %63, %cst_30 [1] : vector<8x128xf32> to vector<8xf32>
    %65 = vector.shape_cast %64 : vector<8xf32> to vector<8x1xf32>
    %66 = arith.addf %60, %65 : vector<8x1xf32>
    %c0_31 = arith.constant 0 : index
    %c0_32 = arith.constant 0 : index
    %67 = vector.load %arg8[%c0_31, %c0_32] : memref<8x1xf32, #tpu.memory_space<vmem>>, vector<8x1xf32>
    tpu.vector_store %arg8[%c0_31, %c0_32], %66 {strides = array<i32>} : memref<8x1xf32, #tpu.memory_space<vmem>>, vector<8x1xf32>,
    %c0_33 = arith.constant 0 : index
    %c0_34 = arith.constant 0 : index
    %68 = vector.load %arg9[%c0_33, %c0_34] : memref<8x1xf32, #tpu.memory_space<vmem>>, vector<8x1xf32>
    %cst_35 = arith.constant 3.000000e+01 : f32
    %69 = vector.broadcast %cst_35 : f32 to vector<8x1xf32>
    %70 = arith.mulf %69, %47 : vector<8x1xf32>
    %cst_36 = arith.constant 0.000000e+00 : f32
    %71 = vector.broadcast %cst_36 : f32 to vector<8x1xf32>
    %72 = arith.select %29, %70, %71 : vector<8x1xi1>, vector<8x1xf32>
    %73 = arith.addf %68, %72 : vector<8x1xf32>
    %c0_37 = arith.constant 0 : index
    %c0_38 = arith.constant 0 : index
    %74 = vector.load %arg9[%c0_37, %c0_38] : memref<8x1xf32, #tpu.memory_space<vmem>>, vector<8x1xf32>
    tpu.vector_store %arg9[%c0_37, %c0_38], %73 {strides = array<i32>} : memref<8x1xf32, #tpu.memory_space<vmem>>, vector<8x1xf32>,
    %c0_i32_39 = arith.constant 0 : i32
    %75 = arith.cmpi eq, %arg0, %c0_i32_39 : i32
    %76 = arith.extui %75 : i1 to i32
    %c0_i32_40 = arith.constant 0 : i32
    %77 = arith.cmpi ne, %76, %c0_i32_40 : i32
    scf.if %77 {
      %c0_41 = arith.constant 0 : index
      %c0_42 = arith.constant 0 : index
      %78 = vector.load %arg8[%c0_41, %c0_42] : memref<8x1xf32, #tpu.memory_space<vmem>>, vector<8x1xf32>
      %79 = math.log %78 : vector<8x1xf32>
      %cst_43 = arith.constant 3.000000e+01 : f32
      %80 = vector.broadcast %cst_43 : f32 to vector<8x1xf32>
      %81 = arith.addf %80, %79 : vector<8x1xf32>
      %c0_44 = arith.constant 0 : index
      %c0_45 = arith.constant 0 : index
      %82 = vector.load %arg9[%c0_44, %c0_45] : memref<8x1xf32, #tpu.memory_space<vmem>>, vector<8x1xf32>
      %83 = arith.subf %81, %82 : vector<8x1xf32>
      %cst_46 = arith.constant dense<0.000000e+00> : vector<1xf32>
      %84 = vector.multi_reduction <add>, %83, %cst_46 [0] : vector<8x1xf32> to vector<1xf32>
      %85 = vector.shape_cast %84 : vector<1xf32> to vector<1x1xf32>
      %cst_47 = arith.constant 1.250000e-01 : f32
      %86 = vector.broadcast %cst_47 : f32 to vector<1x1xf32>
      %87 = arith.mulf %85, %86 : vector<1x1xf32>
      %c0_48 = arith.constant 0 : index
      %c0_49 = arith.constant 0 : index
      %88 = vector.load %arg1[%c0_48, %c0_49] : memref<8x32xf32, #tpu.memory_space<vmem>>, vector<8x32xf32>
      %c0_50 = arith.constant 0 : index
      %c0_51 = arith.constant 0 : index
      %89 = vector.load %arg4[%c0_50, %c0_51] : memref<1x8xi32, #tpu.memory_space<vmem>>, vector<1x8xi32>
      %cst_52 = arith.constant 0.000000e+00 : f32
      %90 = vector.broadcast %cst_52 : f32 to vector<1x1xf32>
      %cst_53 = arith.constant 1.000000e+09 : f32
      %c0_i32_54 = arith.constant 0 : i32
      %c8_i32 = arith.constant 8 : i32
      %91 = arith.muli %c0_i32_54, %c8_i32 : i32
      %92 = tpu.assume_multiple %91, 8 : i32
      %93 = arith.index_cast %92 : i32 to index
      %c0_55 = arith.constant 0 : index
      %94 = vector.load %arg1[%93, %c0_55] : memref<8x32xf32, #tpu.memory_space<vmem>>, vector<8x32xf32>
      %95 = arith.index_cast %92 : i32 to index
      %c0_56 = arith.constant 0 : index
      %96 = vector.load %arg3[%95, %c0_56] : memref<8x1xi32, #tpu.memory_space<vmem>>, vector<8x1xi32>
      %cst_57 = arith.constant dense<0.000000e+00> : vector<8x8xf32>
      %97 = tpu.matmul %94, %88, %cst_57 {dimension_numbers = #tpu.dot_dimension_numbers<[1], [1], [0], [0], [0, 0, 1, 0], [], []>} : vector<8x32xf32>, vector<8x32xf32>, vector<8x8xf32> -> vector<8x8xf32>
      %cst_58 = arith.constant 2.000000e+00 : f32
      %98 = vector.broadcast %cst_58 : f32 to vector<8x8xf32>
      %99 = arith.mulf %98, %97 : vector<8x8xf32>
      %cst_59 = arith.constant 2.000000e+00 : f32
      %100 = vector.broadcast %cst_59 : f32 to vector<8x8xf32>
      %101 = arith.subf %100, %99 : vector<8x8xf32>
      %cst_60 = arith.constant 0.000000e+00 : f32
      %102 = vector.broadcast %cst_60 : f32 to vector<8x8xf32>
      %103 = arith.maximumf %101, %102 : vector<8x8xf32>
      %104 = vector.broadcast %96 : vector<8x1xi32> to vector<8x8xi32>
      %105 = vector.broadcast %89 : vector<1x8xi32> to vector<8x8xi32>
      %106 = arith.cmpi eq, %104, %105 : vector<8x8xi32>
      %107 = tpu.iota {dimensions = array<i32: 0>} : vector<8x8xi32>
      %108 = vector.broadcast %92 : i32 to vector<8x8xi32>
      %109 = arith.addi %108, %107 : vector<8x8xi32>
      %110 = tpu.iota {dimensions = array<i32: 1>} : vector<8x8xi32>
      %111 = arith.cmpi ne, %109, %110 : vector<8x8xi32>
      %112 = arith.andi %106, %111 : vector<8x8xi1>
      %cst_61 = arith.constant dense<true> : vector<8x8xi1>
      %113 = arith.xori %106, %cst_61 : vector<8x8xi1>
      %cst_62 = arith.constant 0.000000e+00 : f32
      %114 = arith.subf %cst_62, %cst_53 : f32
      %115 = vector.broadcast %114 : f32 to vector<8x8xf32>
      %116 = arith.select %112, %103, %115 : vector<8x8xi1>, vector<8x8xf32>
      %cst_63 = arith.constant dense<0xFF800000> : vector<8xf32>
      %117 = vector.multi_reduction <maximumf>, %116, %cst_63 [1] : vector<8x8xf32> to vector<8xf32>
      %118 = vector.shape_cast %117 : vector<8xf32> to vector<8x1xf32>
      %119 = vector.broadcast %cst_53 : f32 to vector<8x8xf32>
      %120 = arith.select %113, %103, %119 : vector<8x8xi1>, vector<8x8xf32>
      %cst_64 = arith.constant dense<0x7F800000> : vector<8xf32>
      %121 = vector.multi_reduction <minimumf>, %120, %cst_64 [1] : vector<8x8xf32> to vector<8xf32>
      %122 = vector.shape_cast %121 : vector<8xf32> to vector<8x1xf32>
      %cst_65 = arith.constant -5.000000e-01 : f32
      %123 = arith.mulf %cst_65, %cst_53 : f32
      %124 = vector.broadcast %123 : f32 to vector<8x1xf32>
      %125 = arith.cmpf ogt, %118, %124 : vector<8x1xf32>
      %cst_66 = arith.constant 5.000000e-01 : f32
      %126 = arith.mulf %cst_66, %cst_53 : f32
      %127 = vector.broadcast %126 : f32 to vector<8x1xf32>
      %128 = arith.cmpf olt, %122, %127 : vector<8x1xf32>
      %129 = arith.andi %125, %128 : vector<8x1xi1>
      %cst_67 = arith.constant 0.000000e+00 : f32
      %130 = vector.broadcast %cst_67 : f32 to vector<8x1xf32>
      %131 = arith.maximumf %118, %130 : vector<8x1xf32>
      %132 = math.sqrt %131 : vector<8x1xf32>
      %cst_68 = arith.constant 0.000000e+00 : f32
      %133 = vector.broadcast %cst_68 : f32 to vector<8x1xf32>
      %134 = arith.maximumf %122, %133 : vector<8x1xf32>
      %135 = math.sqrt %134 : vector<8x1xf32>
      %136 = arith.subf %132, %135 : vector<8x1xf32>
      %cst_69 = arith.constant 3.000000e-01 : f32
      %137 = vector.broadcast %cst_69 : f32 to vector<8x1xf32>
      %138 = arith.addf %136, %137 : vector<8x1xf32>
      %cst_70 = arith.constant 0.000000e+00 : f32
      %139 = vector.broadcast %cst_70 : f32 to vector<8x1xf32>
      %140 = arith.maximumf %138, %139 : vector<8x1xf32>
      %cst_71 = arith.constant 0.000000e+00 : f32
      %141 = vector.broadcast %cst_71 : f32 to vector<8x1xf32>
      %142 = arith.select %129, %140, %141 : vector<8x1xi1>, vector<8x1xf32>
      %cst_72 = arith.constant dense<0.000000e+00> : vector<1xf32>
      %143 = vector.multi_reduction <add>, %142, %cst_72 [0] : vector<8x1xf32> to vector<1xf32>
      %144 = vector.shape_cast %143 : vector<1xf32> to vector<1x1xf32>
      %145 = arith.addf %90, %144 : vector<1x1xf32>
      %cst_73 = arith.constant 0.000000e+00 : f32
      %146 = vector.broadcast %cst_73 : f32 to vector<8x1xf32>
      %147 = arith.cmpf ogt, %142, %146 : vector<8x1xf32>
      %148 = arith.extui %147 : vector<8x1xi1> to vector<8x1xi32>
      %149 = arith.sitofp %148 : vector<8x1xi32> to vector<8x1xf32>
      %cst_74 = arith.constant dense<0.000000e+00> : vector<1xf32>
      %150 = vector.multi_reduction <add>, %149, %cst_74 [0] : vector<8x1xf32> to vector<1xf32>
      %151 = vector.shape_cast %150 : vector<1xf32> to vector<1x1xf32>
      %152 = arith.addf %90, %151 : vector<1x1xf32>
      %c1_i32 = arith.constant 1 : i32
      %cst_75 = arith.constant 0.000000e+00 : f32
      %153 = vector.broadcast %cst_75 : f32 to vector<1x1xf32>
      %154 = arith.cmpf ogt, %152, %153 : vector<1x1xf32>
      %cst_76 = arith.constant 1.000000e+00 : f32
      %155 = vector.broadcast %cst_76 : f32 to vector<1x1xf32>
      %156 = arith.maximumf %152, %155 : vector<1x1xf32>
      %157 = arith.divf %145, %156 : vector<1x1xf32>
      %158 = arith.select %154, %157, %90 : vector<1x1xi1>, vector<1x1xf32>
      %c0_77 = arith.constant 0 : index
      %c0_78 = arith.constant 0 : index
      %159 = vector.load %arg5[%c0_77, %c0_78] : memref<8x32xf32, #tpu.memory_space<vmem>>, vector<8x32xf32>
      %160 = arith.subf %88, %159 : vector<8x32xf32>
      %161 = arith.mulf %160, %160 : vector<8x32xf32>
      %cst_79 = arith.constant dense<0.000000e+00> : vector<8xf32>
      %162 = vector.multi_reduction <add>, %161, %cst_79 [1] : vector<8x32xf32> to vector<8xf32>
      %163 = vector.shape_cast %162 : vector<8xf32> to vector<8x1xf32>
      %cst_80 = arith.constant dense<0.000000e+00> : vector<1xf32>
      %164 = vector.multi_reduction <add>, %163, %cst_80 [0] : vector<8x1xf32> to vector<1xf32>
      %165 = vector.shape_cast %164 : vector<1xf32> to vector<1x1xf32>
      %cst_81 = arith.constant 1.250000e-01 : f32
      %166 = vector.broadcast %cst_81 : f32 to vector<1x1xf32>
      %167 = arith.mulf %165, %166 : vector<1x1xf32>
      %cst_82 = arith.constant 5.000000e-01 : f32
      %168 = vector.broadcast %cst_82 : f32 to vector<1x1xf32>
      %169 = arith.mulf %168, %158 : vector<1x1xf32>
      %170 = arith.addf %87, %169 : vector<1x1xf32>
      %cst_83 = arith.constant 0.00999999977 : f32
      %171 = vector.broadcast %cst_83 : f32 to vector<1x1xf32>
      %172 = arith.mulf %171, %167 : vector<1x1xf32>
      %173 = arith.addf %170, %172 : vector<1x1xf32>
      %c0_84 = arith.constant 0 : index
      %c0_85 = arith.constant 0 : index
      %174 = vector.load %arg7[%c0_84, %c0_85] : memref<1x1xf32, #tpu.memory_space<vmem>>, vector<1x1xf32>
      tpu.vector_store %arg7[%c0_84, %c0_85], %173 {strides = array<i32>} : memref<1x1xf32, #tpu.memory_space<vmem>>, vector<1x1xf32>,
    } else {
    }
    return
  }
  func.func @transform_0(%arg0: i32) -> (i32, i32) {
    %c0_i32 = arith.constant 0 : i32
    %c0_i32_0 = arith.constant 0 : i32
    %c0_i32_1 = arith.constant 0 : i32
    return %c0_i32, %c0_i32_0 : i32, i32
  }
  func.func @transform_1(%arg0: i32) -> (i32, i32) {
    %c0_i32 = arith.constant 0 : i32
    %c0_i32_0 = arith.constant 0 : i32
    %c0_i32_1 = arith.constant 0 : i32
    return %c0_i32, %c0_i32_0 : i32, i32
  }
  func.func @transform_2(%arg0: i32) -> (i32, i32) {
    %c0_i32 = arith.constant 0 : i32
    %c0_i32_0 = arith.constant 0 : i32
    %c0_i32_1 = arith.constant 0 : i32
    return %c0_i32, %c0_i32_0 : i32, i32
  }
  func.func @transform_3(%arg0: i32) -> (i32, i32) {
    %c0_i32 = arith.constant 0 : i32
    %c0_i32_0 = arith.constant 0 : i32
    %c0_i32_1 = arith.constant 0 : i32
    return %c0_i32, %c0_i32_0 : i32, i32
  }
  func.func @transform_4(%arg0: i32) -> (i32, i32) {
    %c0_i32 = arith.constant 0 : i32
    %c0_i32_0 = arith.constant 0 : i32
    %c0_i32_1 = arith.constant 0 : i32
    return %c0_i32, %c0_i32_0 : i32, i32
  }
  func.func @transform_5(%arg0: i32) -> (i32, i32, i32, i32) {
    %c0_i32 = arith.constant 0 : i32
    %c0_i32_0 = arith.constant 0 : i32
    %c0_i32_1 = arith.constant 0 : i32
    %c0_i32_2 = arith.constant 0 : i32
    return %arg0, %c0_i32, %c0_i32_0, %c0_i32_1 : i32, i32, i32, i32
  }
  func.func @transform_6(%arg0: i32) -> (i32, i32) {
    %c0_i32 = arith.constant 0 : i32
    %c0_i32_0 = arith.constant 0 : i32
    %c0_i32_1 = arith.constant 0 : i32
    return %c0_i32, %c0_i32_0 : i32, i32
  }
}

</mosaic_0001>

<bundles_post_ra>
// kernel: tpu_custom_call.1
= control target key start
LH: loop header
LB: loop body
LE: loop exit
PB: predicated region body
PF: predicated region fallthrough
CT: control target
= control target key end

     0   :  { %11 = vsyncpa [#allocation5], 0  ;;  %s682_s0 = inlined_call_operand.vmem [shape: f32[8,32], index: 0, kind: input, shape index: {}]   ;;  %s683_s1 = inlined_call_operand.hbm [shape: bf16[8,32], index: 1, kind: input, shape index: {}]   ;;  %s684_s2 = inlined_call_operand.vmem [shape: s32[8,1], index: 2, kind: input, shape index: {}]   ;;  %s685_s3 = inlined_call_operand.vmem [shape: s32[1,8], index: 3, kind: input, shape index: {}]   ;;  %s686_s4 = inlined_call_operand.hbm [shape: f32[8,32], index: 4, kind: input, shape index: {}]   ;;  %s687_s5 = inlined_call_operand.hbm [shape: bf16[1,3,32,128], index: 5, kind: input, shape index: {}]   ;;  %s688_s6 = inlined_call_operand.hbm [shape: f32[1,1], index: 6, kind: output, shape index: {}]  }
   0x1   :  { %12 = vsyncpa [#allocation8], 0  ;;  %s36_s23 = sshll.u32 %s686_s4, 4  ;;  %s37_s23 = int_to_ptr.hbm [resolvable:$true] %s36_s23 }
   0x2   :  { %13 = vsyncpa [#allocation6], 0  ;;  %s578_s24 = smov [#allocation7]   ;;  %s21_s28 = sshll.u32 %s683_s1, 4  ;;  %s22_s28 = int_to_ptr.hbm [resolvable:$true] %s21_s28 }
   0x3   :  { %s38_s25 = sshll.u32 %s578_s24, 4  ;;  %s579_s29 = smov [#allocation4]   ;;  %s39_s25 = int_to_ptr.vmem [resolvable:$true] %s38_s25 }
   0x4   :  { %41 = dma.hbm_to_vmem [thread:$0]  %s37_s23, 128, %s39_s25, [#allocation8]  }
   0x5   :  { %s23_s30 = sshll.u32 %s579_s29, 4  ;;  %s46_s9 = sshll.u32 %s687_s5, 4  ;;  %s24_s30 = int_to_ptr.vmem [resolvable:$true] %s23_s30  ;;  %s47_s9 = int_to_ptr.hbm [resolvable:$true] %s46_s9 }
   0x6   :  { %26 = dma.hbm_to_vmem [thread:$0]  %s22_s28, 64, %s24_s30, [#allocation5]  }
   0x7   :  { %s580_s4 = smov [#allocation9]   ;;  %s581_s11 = smov 64  }
   0x8   :  { %s48_s10 = sshll.u32 %s580_s4, 4  ;;  %s582_s12 = smov 4   ;;  %s49_s10 = int_to_ptr.vmem [resolvable:$true] %s48_s10 }
   0x9   :  { %54 = dma.hbm_to_vmem [thread:$0]  %s47_s9, 768, %s49_s10, [#allocation8], %s581_s11, %s581_s11, %s582_s12  }
   0xa   :  { %572 = dma.done.wait [#allocation5], 64  }
   0xb   :  { %573 = vsyncadd [#allocation5], 4294967232 }
   0xc   :  { %574 = dma.done.wait [#allocation8], 896  }
   0xd   :  { %575 = vsyncadd [#allocation8], 4294966400  ;;  %v583_v0 = vmov 0   ;;  %v447_v1 = vld [vmem:[#allocation9 + $0x8] sm:$0xff]  ;;  %v449_v2 = vld [vmem:[#allocation9 + $0x18] sm:$0xff]  ;;  %vm93_vm0 = vcmask 261120   ;;  %v173_v11 = vlaneseq }
   0xe   :  { %461 = vset.pattern.permute.xlu0 %v583_v0  ;;  %462 = vset.pattern.permute.xlu1 %v583_v0  ;;  %v451_v3 = vld [vmem:[#allocation9 + $0x28] sm:$0xff]  ;;  %v446_v4 = vld [vmem:[#allocation9] sm:$0xff]  ;;  %v448_v5 = vld [vmem:[#allocation9 + $0x10] sm:$0xff]  ;;  %vm72_vm1 = vcmask 7168   ;;  %v584_v9 = vmov 0.0   ;;  %vm300_vm6 = vcmask 64512  }
   0xf   :  { %103 = vmatpush.bf16.msra.mxu0 %v447_v1  ;;  %133 = vmatpush.bf16.msra.mxu1 %v449_v2  ;;  %v634_v6 = vld [vmem:[%s684_s2] sm:$0xff]  ;;  %v76_v8 = vld [vmem:[#allocation4] sm:$0xf]  ;;  %73 = vst.msk [vmem:[#allocation2] sm:$0xff] %vm72_vm1, %v584_v9  ;;  %v654_v14 = vand.u32 127, %v173_v11  ;;  %v293_v30 = vshrl.u32 %v173_v11, 7 }
  0x10   :  { %164 = vmatpush.bf16.msra.mxu2 %v451_v3  ;;  %v450_v7 = vld [vmem:[#allocation9 + $0x20] sm:$0xff]  ;;  %178 = vperm.xlu0 %461, %v634_v6   ;;  %74 = vst.msk [vmem:[#allocation3] sm:$0xff] %vm72_vm1, %v584_v9  ;;  %vm585_vm7 = vmmov 1   ;;  %vm183_vm11 = vcmp.ge.s32.totalorder %v634_v6, 0  ;;  %vm186_vm12 = vcmp.lt.s32.totalorder %v634_v6, 128  ;;  %v376_v59 = vld [vmem:[#allocation7] sm:$0xff] }
  0x11   :  { %288 = vperm.xlu1 %462, %v634_v6   ;;  %v648_v10 = vld [vmem:[%s682_s0] sm:$0xff]  ;;  %vm296_vm3 = vcmp.ne.s32.totalorder %v293_v30, %v654_v14  ;;  %vm187_vm13 = vmand %vm183_vm11, %vm186_vm12  ;;  %vm221_vm14 = vcmp.lt.s32.totalorder %v654_v14, 4  ;;  %s402_s18 = sshll.u32 %s688_s6, 4  ;;  %s403_s18 = int_to_ptr.hbm [resolvable:$true] %s402_s18 }
  0x12   :  { %443 = vmatpush.xpose.msk.msra.mxu3 %vm93_vm0, %v648_v10  ;;  %v463_v32 = vld [vmem:[%s685_s3] ss:$0 sm:$0xff]  ;;  %v377_v60 = vsub.f32 %v648_v10, %v376_v59  ;;  %s586_s3 = smov [#allocation10]  }
  0x13   :  { %104 = vmatpush.bf16.msra.mxu0 %v446_v4  ;;  %134 = vmatpush.bf16.msra.mxu1 %v448_v5  ;;  %s400_s15 = sshll.u32 %s586_s3, 4  ;;  %s401_s15 = int_to_ptr.vmem [resolvable:$true] %s400_s15 }
  0x14   :  { %165 = vmatpush.bf16.msra.mxu2 %v450_v7  ;;  %v378_v61 = vmul.f32 %v377_v60, %v377_v60 }
  0x15   :  { %444 = vmatmul.msk.f32.vlgmr.msra.gmra.mxu3 %vm93_vm0, %v648_v10 }
  0x16   :  { %421 = vmatmul.msk.bf16.vlgmr.msra.gmra.mxu0 %vm93_vm0, %v76_v8  ;;  %430 = vmatmul.msk.bf16.vlgmr.msra.gmra.mxu1 %vm93_vm0, %v76_v8  ;;  %v379_v62 = vsel %vm93_vm0, %v378_v61, 0.0 }
  0x17   :  { %439 = vmatmul.msk.bf16.vlgmr.msra.gmra.mxu2 %vm93_vm0, %v76_v8  ;;  %v232_v55 = vld [vmem:[#allocation3] sm:$0xff] }
  0x82   :  { %v179_v15 = vpop.permute.xlu0 %178 }
  0x83   :  { %vm180_vm2 = vcmp.eq.s32.totalorder %v179_v15, %v654_v14  ;;  %v289_v31 = vpop.permute.xlu1 %288 }
  0x84   :  { %v658_v18 = vsel %vm180_vm2, 1.0, %v584_v9  ;;  %vm291_vm4 = vcmp.eq.s32.totalorder %v289_v31, %v463_v32 }
  0x85   :  { %vm297_vm5 = vmand %vm291_vm4, %vm296_vm3 }
  0x86   :  { %vm298_vm8 = vmxor %vm291_vm4, %vm585_vm7 }
  0x93   :  { %v106_v12 = vpop.f32.mrf.mxu0  ;;  %v136_v13 = vpop.f32.mrf.mxu1 }
  0x94   :  { %v140_v16 = vmax.f32 %v106_v12, %v136_v13 }
  0x98   :  { %v281_v29 = vpop.f32.mrf.mxu3 }
  0x99   :  { %v284_v33 = vmul.f32 2.0, %v281_v29 }
  0x9a   :  { %v167_v17 = vpop.f32.mrf.mxu2 }
  0x9b   :  { %v660_v19 = vmax.f32 %v140_v16, %v167_v17  ;;  %v108_v20 = vpop.f32.mrf.mxu0  ;;  %v138_v21 = vpop.f32.mrf.mxu1  ;;  %v285_v34 = vsub.f32 2.0, %v284_v33 }
  0x9d   :  { %v188_v22 = vmul.f32 %v658_v18, %v660_v19  ;;  %v286_v35 = vmax.f32 %v285_v34, 0.0 }
  0x9f   :  { %189 = vadd.xlane.f32.xlu0 %v188_v22  ;;  %v299_v36 = vsel %vm297_vm5, %v286_v35, -1e+09  ;;  %v304_v41 = vsel %vm298_vm8, %v286_v35, 1e+09 }
  0xa0   :  { %v301_v38 = vsel %vm300_vm6, %v299_v36, -inf  ;;  %v305_v43 = vsel %vm300_vm6, %v304_v41, inf }
  0xa1   :  { %302 = vmax.xlane.f32.xlu2 %v301_v38 }
  0xa2   :  { %v169_v23 = vpop.f32.mrf.mxu2 }
  0xa9   :  { %306 = vmin.xlane.f32.xlu2 %v305_v43 }
  0xb1   :  { %380 = vadd.xlane.f32.xlu2 %v379_v62 }
 0x112   :  { %v190_v24 = vpop.xlane.xlu0 %189 }
 0x113   :  { %v441_v25 = vclamps-f32 %v190_v24, 0.9999999 }
 0x114   :  { %v303_v7 = vpop.xlane.xlu2 %302 }
 0x115   :  { %v193_v26 = vmul.f32 %v441_v25, %v441_v25  ;;  %v208_v50 = vmul.f32 0.921061, %v441_v25  ;;  %v311_v10 = vmax.f32 %v303_v7, 0.0  ;;  %vm308_vm4 = vcmp.gt.f32.partialorder %v303_v7, -5e+08 }
 0x117   :  { %v194_v27 = vsub.f32 1.0, %v193_v26  ;;  %vm319_vm15 = vcmp.eq.f32.partialorder %v311_v10, inf  ;;  %v322_v26 = vand.u32 2147483648, %v311_v10  ;;  %vm321_vm2 = vcmp.eq.f32.partialorder %v311_v10, 0.0 }
 0x119   :  { %v195_v28 = vmax.f32 %v194_v27, 0.0 }
 0x11b   :  { %464 = vrsqrt.f32 %v195_v28  ;;  %vm203_vm9 = vcmp.eq.f32.partialorder %v195_v28, inf  ;;  %v206_v47 = vand.u32 2147483648, %v195_v28  ;;  %vm205_vm10 = vcmp.eq.f32.partialorder %v195_v28, 0.0 }
 0x11c   :  { %v307_v8 = vpop.xlane.xlu2 %306 }
 0x11d   :  { %v324_v11 = vmax.f32 %v307_v8, 0.0  ;;  %vm309_vm5 = vcmp.lt.f32.partialorder %v307_v8, 5e+08 }
 0x11e   :  { %vm310_vm6 = vmand %vm308_vm4, %vm309_vm5 }
 0x11f   :  { %vm332_vm0 = vcmp.eq.f32.partialorder %v324_v11, inf  ;;  %v335_v27 = vand.u32 2147483648, %v324_v11  ;;  %vm334_vm3 = vcmp.eq.f32.partialorder %v324_v11, 0.0 }
 0x121   :  { %v465_v37 = vpop.eup %464 }
 0x122   :  { %v197_v39 = vmul.f32 %v465_v37, %v195_v28 }
 0x124   :  { %v198_v40 = vmul.f32 %v465_v37, %v197_v39 }
 0x126   :  { %v199_v42 = vmul.f32 0.5, %v198_v40 }
 0x128   :  { %v200_v44 = vsub.f32 1.5, %v199_v42 }
 0x12a   :  { %v201_v45 = vmul.f32 %v465_v37, %v200_v44  ;;  %v223_v44 = vld [vmem:[#allocation2] sm:$0xff] }
 0x12c   :  { %v202_v46 = vmul.f32 %v201_v45, %v195_v28 }
 0x12e   :  { %v204_v48 = vsel %vm203_vm9, %v195_v28, %v202_v46 }
 0x12f   :  { %v207_v49 = vsel %vm205_vm10, %v206_v47, %v204_v48 }
 0x130   :  { %v209_v51 = vmul.f32 0.38941833, %v207_v49 }
 0x132   :  { %v210_v52 = vsub.f32 %v208_v50, %v209_v51  ;;  %v381_v50 = vpop.xlane.xlu2 %380 }
 0x134   :  { %v211_v53 = vsub.f32 %v210_v52, %v190_v24  ;;  %v233_v54 = vmul.f32 30.0, %v210_v52 }
 0x136   :  { %v212_v56 = vsel %vm187_vm13, %v211_v53, 0.0  ;;  %v234_v57 = vsel %vm187_vm13, %v233_v54, 0.0 }
 0x137   :  { %215 = vperm.xlu1 %462, %v212_v56   ;;  %v235_v58 = vadd.f32 %v234_v57, %v232_v55 }
 0x139   :  { %236 = vst.msk [vmem:[#allocation3] sm:$0xff] %vm72_vm1, %v235_v58 }
 0x1a9   :  { %v216_v63 = vpop.permute.xlu1 %215 }
 0x1aa   :  { %v218_v0 = vmul.f32 %v658_v18, %v216_v63 }
 0x1ac   :  { %v219_v1 = vadd.f32 %v218_v0, %v660_v19 }
 0x1ae   :  { %v220_v2 = vmul.f32 30.0, %v219_v1  ;;  %v244_v1 = vld [vmem:[#allocation3] sm:$0xff] }
 0x1b0   :  { %v222_v3 = vsel %vm221_vm14, %v220_v2, -1e+30 }
 0x1b1   :  { %v442_v4 = vadd.f32 -30.0, %v222_v3 }
 0x1b3   :  { %v225_v5 = vmul.f32 1.442695, %v442_v4 }
 0x1b5   :  { %466 = vpow2.f32 %v225_v5 }
 0x1b6   :  { %468 = vrsqrt.f32 %v311_v10 }
 0x1b7   :  { %470 = vrsqrt.f32 %v324_v11 }
 0x1bb   :  { %v467_v6 = vpop.eup %466 }
 0x1bc   :  { %227 = vadd.xlane.f32.xlu1 %v467_v6  ;;  %v469_v12 = vpop.eup %468 }
 0x1bd   :  { %v471_v13 = vpop.eup %470  ;;  %v313_v15 = vmul.f32 %v469_v12, %v311_v10 }
 0x1be   :  { %v326_v16 = vmul.f32 %v471_v13, %v324_v11 }
 0x1bf   :  { %v314_v17 = vmul.f32 %v469_v12, %v313_v15 }
 0x1c0   :  { %v327_v18 = vmul.f32 %v471_v13, %v326_v16 }
 0x1c1   :  { %v315_v14 = vmul.f32 0.5, %v314_v17 }
 0x1c2   :  { %v328_v19 = vmul.f32 0.5, %v327_v18 }
 0x1c3   :  { %v316_v20 = vsub.f32 1.5, %v315_v14 }
 0x1c4   :  { %v329_v21 = vsub.f32 1.5, %v328_v19 }
 0x1c5   :  { %v317_v22 = vmul.f32 %v469_v12, %v316_v20 }
 0x1c6   :  { %v330_v23 = vmul.f32 %v471_v13, %v329_v21 }
 0x1c7   :  { %v318_v24 = vmul.f32 %v317_v22, %v311_v10 }
 0x1c8   :  { %v331_v25 = vmul.f32 %v330_v23, %v324_v11 }
 0x1c9   :  { %v320_v28 = vsel %vm319_vm15, %v311_v10, %v318_v24 }
 0x1ca   :  { %v333_v29 = vsel %vm332_vm0, %v324_v11, %v331_v25  ;;  %v323_v30 = vsel %vm321_vm2, %v322_v26, %v320_v28 }
 0x1cb   :  { %v336_v31 = vsel %vm334_vm3, %v335_v27, %v333_v29 }
 0x1cc   :  { %v337_v32 = vsub.f32 %v323_v30, %v336_v31 }
 0x1ce   :  { %v338_v33 = vadd.f32 0.3, %v337_v32 }
 0x1d0   :  { %v339_v34 = vmax.f32 %v338_v33, 0.0 }
 0x1d2   :  { %v340_v35 = vsel %vm310_vm6, %v339_v34, 0.0 }
 0x1d3   :  { %vm348_vm7 = vcmp.gt.f32.partialorder %v340_v35, 0.0  ;;  %v341_v48 = vrot.slane %v340_v35, 4 }
 0x1d4   :  { %v445_v36 = vsel %vm348_vm7, 1.0, %v584_v9  ;;  %v382_v9 = vrot.slane %v381_v50, 4 }
 0x1d5   :  { %v351_v37 = vrot.slane %v445_v36, 4  ;;  %v342_v51 = vadd.f32 %v341_v48, %v340_v35 }
 0x1d6   :  { %v383_v55 = vadd.f32 %v382_v9, %v381_v50 }
 0x1d7   :  { %v352_v38 = vadd.f32 %v445_v36, %v351_v37  ;;  %v343_v54 = vrot.slane %v342_v51, 2 }
 0x1d8   :  { %v384_v61 = vrot.slane %v383_v55, 2 }
 0x1d9   :  { %v353_v39 = vrot.slane %v352_v38, 2  ;;  %v344_v58 = vadd.f32 %v343_v54, %v342_v51 }
 0x1da   :  { %v385_v5 = vadd.f32 %v384_v61, %v383_v55 }
 0x1db   :  { %v354_v40 = vadd.f32 %v353_v39, %v352_v38  ;;  %v345_v2 = vrot.slane %v344_v58, 1 }
 0x1dc   :  { %v386_v13 = vrot.slane %v385_v5, 1 }
 0x1dd   :  { %v355_v41 = vrot.slane %v354_v40, 1  ;;  %v346_v10 = vadd.f32 %v345_v2, %v344_v58 }
 0x1de   :  { %v387_v18 = vadd.f32 %v386_v13, %v385_v5 }
 0x1df   :  { %v356_v42 = vadd.f32 %v355_v41, %v354_v40 }
 0x1e0   :  { %v388_v21 = vmul.f32 0.125, %v387_v18 }
 0x1e1   :  { %v359_v43 = vmax.f32 %v356_v42, 1.0  ;;  %vm358_vm12 = vcmp.gt.f32.partialorder %v356_v42, 0.0 }
 0x1e2   :  { %v391_v25 = vmul.f32 0.01, %v388_v21 }
 0x1e3   :  { %472 = vrcp.f32 %v359_v43  ;;  %vm365_vm8 = vweird.f32 %v359_v43  ;;  %v371_v60 = vand.u32 2147483648, %v359_v43  ;;  %v369_v63 = vand.u32 2147483647, %v359_v43 }
 0x1e5   :  { %v372_v4 = vor.u32 1.1754944e-38, %v371_v60  ;;  %vm370_vm11 = vcmp.eq.f32.partialorder %v369_v63, 8.507059e+37 }
 0x1e9   :  { %v473_v47 = vpop.eup %472 }
 0x1ea   :  { %v361_v49 = vmul.f32 %v473_v47, %v359_v43  ;;  %vm366_vm9 = vweird.f32 %v473_v47 }
 0x1eb   :  { %vm367_vm10 = vmor %vm365_vm8, %vm366_vm9 }
 0x1ec   :  { %v362_v53 = vsub.f32 1.0, %v361_v49 }
 0x1ee   :  { %v363_v56 = vmul.f32 %v473_v47, %v362_v53 }
 0x1f0   :  { %v364_v62 = vadd.f32 %v473_v47, %v363_v56 }
 0x1f2   :  { %v368_v6 = vsel %vm367_vm10, %v473_v47, %v364_v62 }
 0x1f3   :  { %v373_v11 = vsel %vm370_vm11, %v372_v4, %v368_v6 }
 0x1f4   :  { %v374_v16 = vmul.f32 %v373_v11, %v346_v10 }
 0x1f6   :  { %v375_v19 = vsel %vm358_vm12, %v374_v16, 0.0 }
 0x1f7   :  { %v389_v22 = vmul.f32 0.5, %v375_v19 }
 0x22f   :  { %v228_v45 = vpop.xlane.xlu1 %227 }
 0x230   :  { %v229_v46 = vadd.f32 %v228_v45, %v223_v44 }
 0x232   :  { %231 = vst.msk [vmem:[#allocation2] sm:$0xff] %vm72_vm1, %v229_v46 }
 0x239   :  { %v240_v52 = vld [vmem:[#allocation2] sm:$0xff] }
 0x23a   :  { %474 = vlog2.f32 %v240_v52 }
 0x240   :  { %v475_v57 = vpop.eup %474 }
 0x241   :  { %v242_v59 = vmul.f32 0.6931472, %v475_v57 }
 0x243   :  { %v243_v0 = vadd.f32 30.0, %v242_v59 }
 0x245   :  { %v245_v3 = vsub.f32 %v243_v0, %v244_v1 }
 0x247   :  { %v246_v7 = vsel %vm72_vm1, %v245_v3, 0.0  ;;  %vm393_vm1 = vcmask 0  }
 0x248   :  { %v247_v8 = vrot.slane %v246_v7, 4 }
 0x24a   :  { %v248_v12 = vadd.f32 %v247_v8, %v246_v7 }
 0x24c   :  { %v249_v15 = vrot.slane %v248_v12, 2 }
 0x24e   :  { %v250_v17 = vadd.f32 %v249_v15, %v248_v12 }
 0x250   :  { %v251_v14 = vrot.slane %v250_v17, 1 }
 0x252   :  { %v252_v20 = vadd.f32 %v251_v14, %v250_v17 }
 0x254   :  { %v253_v23 = vmul.f32 0.125, %v252_v20 }
 0x256   :  { %v390_v24 = vadd.f32 %v389_v22, %v253_v23 }
 0x258   :  { %v392_v26 = vadd.f32 %v391_v25, %v390_v24 }
 0x25a   :  { %394 = vst.msk [vmem:[#allocation10] sm:$0x1] %vm393_vm1, %v392_v26 }
 0x25b   :  { %405 = dma.vmem_to_hbm [thread:$0]  %s401_s15, 16, %s403_s18, [#allocation6]  }
 0x25c   :  { %576 = dma.done.wait [#allocation6], 16  }
 0x25d   :  { %577 = vsyncadd [#allocation6], 4294967280 }
 0x25e   :  { %410 = vsyncpa [#allocation5], 1 }
 0x25f   :  { %411 = vsyncpa [#allocation8], 1 }
 0x260   :  { %412 = vsyncpa [#allocation6], 1 }

</bundles_post_ra>
